<compile_context>
chip_gen: v7x
topology: tpu7x:2x2x1
jax: 0.10.0
libtpu: 0.0.40
codegen_flags: <defaults>
</compile_context>

<pallas_src>
import functools

import jax
import jax.numpy as jnp
from jax import lax
from jax.experimental import pallas as pl
from jax.experimental.pallas import tpu as pltpu


def _softplus_pt(z):
    # PyTorch Softplus (beta=1, threshold=20): z if z > 20 else log1p(exp(z)).
    return jnp.where(z > 20.0, z, jnp.log1p(jnp.exp(jnp.minimum(z, 20.0))))


def hgcn_kernel(x_ref, h_ref, w_ref, gb_ref, o_ref, *, B, N, C):
    # x_ref : (B, C, N) f32   transposed feature (residual source), nodes on lanes
    # h_ref : (B, N, N) f32   adjacency H[b, n, m]
    # w_ref : (3, C, C) bf16  transposed GCN weights: w_ref[l, co, ci] = W_l[ci, co]
    # gb_ref: (3, 2, N) f32   packed BN affine params: [l,0,:]=gamma, [l,1,:]=beta
    # o_ref : (B, C, N) f32   output (transposed)
    x = x_ref[...]                                   # (B, C, N) fp32
    Hb = h_ref[...].astype(jnp.bfloat16)             # cast once; reused by all 3 layers
    eps = 1e-5
    inv_bc = 1.0 / (B * C)

    out = x
    for layer in range(3):                           # static unroll: gc1/bn1 .. gc3/bn3
        # --- GCN matmul #1: support[b,co,n] = sum_ci W[ci,co] * out[b,ci,n]
        #     (tiny K=C; output lane dim is N).
        Wt = jnp.broadcast_to(w_ref[layer], (B, C, C))          # (B, Co, Ci) bf16, tiny
        support = lax.dot_general(
            Wt, out.astype(jnp.bfloat16),
            dimension_numbers=(((2,), (1,)), ((0,), (0,))),
            preferred_element_type=jnp.float32)                 # (B, C, N) f32

        # --- GCN matmul #2: gc[b,c,n] = sum_m support[b,c,m] * H[b,n,m]
        #     (contract last dims of both -> full-width MXU output tiles, K = N).
        gc = lax.dot_general(
            support.astype(jnp.bfloat16), Hb,
            dimension_numbers=(((2,), (2,)), ((0,), (0,))),
            preferred_element_type=jnp.float32)                 # (B, C, N) f32

        # --- BatchNorm1d(num_features=N): per-node stats over (batch, C);
        #     two-pass (centered) variance; all elementwise math stays fp32
        #     (safe on v5e: no bf16 VPU/EUP path).
        mean = jnp.sum(gc, axis=(0, 1), keepdims=True) * inv_bc          # (1, 1, N)
        centered = gc - mean
        var = jnp.sum(centered * centered, axis=(0, 1), keepdims=True) * inv_bc
        gb = gb_ref[layer]                                               # (2, N)
        gamma = gb[0][None, None, :]                                     # (1, 1, N)
        beta = gb[1][None, None, :]
        y = centered * (lax.rsqrt(var + eps) * gamma) + beta

        # --- residual (ORIGINAL feature) + Softplus.
        out = _softplus_pt(x + y)                                        # (B, C, N)

    o_ref[...] = out


@jax.jit
def hgcn_layer_pallas(feature, H, weights, gammas, betas):
    """feature (B,N,C); H (B,N,N); weights (3,C,C); gammas/betas (3,N)."""
    B, N, C = feature.shape
    # Layout plumbing on the small arrays only (nodes -> lanes).  H is passed
    # through untouched (fp32) and cast to bf16 once inside the kernel.
    x_t = jnp.swapaxes(feature.astype(jnp.float32), 1, 2)        # (B, C, N)
    w_t = jnp.swapaxes(weights, 1, 2).astype(jnp.bfloat16)       # (3, Co, Ci), MXU-only
    gb = jnp.stack([gammas, betas], axis=1).astype(jnp.float32)  # (3, 2, N) lane-dense
    vmem = pl.BlockSpec(memory_space=pltpu.MemorySpace.VMEM)
    kernel = functools.partial(hgcn_kernel, B=B, N=N, C=C)
    out_t = pl.pallas_call(
        kernel,
        out_shape=jax.ShapeDtypeStruct((B, C, N), jnp.float32),
        in_specs=[vmem, vmem, vmem, vmem],
        out_specs=vmem,
        # No grid: at these shapes the whole working set is VMEM-resident and the
        # call is launch-bound.  Explicit VMEM budget (above the 16/32 MiB scoped
        # defaults, below v7x's 64 MiB physical) so H can stay resident across
        # the 3 layers at larger N.
        compiler_params=pltpu.CompilerParams(vmem_limit_bytes=48 * 1024 * 1024),
    )(x_t, H.astype(jnp.float32), w_t, gb)
    return jnp.swapaxes(out_t, 1, 2)                             # back to (B, N, C)


def hgcn_layer_ref_matched(feature, H, weights, gammas, betas):
    """Pure-JAX reference with the SAME numerics as the kernel
    (bf16 MXU operands, fp32 accumulation, (B,C,N) layout, two-pass BN stats)."""
    B, N, C = feature.shape
    x = jnp.swapaxes(feature.astype(jnp.float32), 1, 2)          # (B, C, N)
    Hb = H.astype(jnp.float32).astype(jnp.bfloat16)              # (B, N, N)
    eps = 1e-5
    inv_bc = 1.0 / (B * C)
    out = x
    for layer in range(3):
        Wt = jnp.broadcast_to(weights[layer].T.astype(jnp.bfloat16), (B, C, C))
        support = lax.dot_general(
            Wt, out.astype(jnp.bfloat16),
            dimension_numbers=(((2,), (1,)), ((0,), (0,))),
            preferred_element_type=jnp.float32)
        gc = lax.dot_general(
            support.astype(jnp.bfloat16), Hb,
            dimension_numbers=(((2,), (2,)), ((0,), (0,))),
            preferred_element_type=jnp.float32)
        mean = jnp.sum(gc, axis=(0, 1), keepdims=True) * inv_bc
        centered = gc - mean
        var = jnp.sum(centered * centered, axis=(0, 1), keepdims=True) * inv_bc
        gamma = gammas[layer][None, None, :]
        beta = betas[layer][None, None, :]
        y = centered * (lax.rsqrt(var + eps) * gamma) + beta
        out = _softplus_pt(x + y)
    return jnp.swapaxes(out, 1, 2)                               # (B, N, C)


def hgcn_layer_ref_f32(feature, H, weights, gammas, betas):
    """Pure-fp32 reference mirroring the PyTorch training-mode forward."""
    x = feature.astype(jnp.float32)
    Hf = H.astype(jnp.float32)
    eps = 1e-5
    out = x
    for layer in range(3):
        support = jnp.einsum("bnc,cd->bnd", out, weights[layer])
        gc = jnp.einsum("bnm,bmc->bnc", Hf, support)
        mean = jnp.mean(gc, axis=(0, 2), keepdims=True)
        var = jnp.mean((gc - mean) ** 2, axis=(0, 2), keepdims=True)
        y = (gc - mean) / jnp.sqrt(var + eps) * gammas[layer][None, :, None] \
            + betas[layer][None, :, None]
        out = _softplus_pt(x + y)
    return out


if __name__ == "__main__":
    B, N, C = 2, 16, 8   # batch, img_len (graph nodes), in_c (channels)

    key = jax.random.PRNGKey(0)
    k_feat, k_adj, k_w = jax.random.split(key, 3)

    # Inputs
    feature = jax.random.normal(k_feat, (B, N, C), dtype=jnp.float32)
    adj_raw = jax.random.uniform(k_adj, (B, N, N), dtype=jnp.float32)
    # row-normalized adjacency (typical hypergraph / GCN propagation matrix)
    H = adj_raw / jnp.sum(adj_raw, axis=-1, keepdims=True)

    # Parameters (deterministic init):
    #  - GCN weights: xavier_normal_ equivalent, std = sqrt(2 / (fan_in + fan_out))
    xavier_std = (2.0 / (C + C)) ** 0.5
    weights = jax.random.normal(k_w, (3, C, C), dtype=jnp.float32) * xavier_std
    #  - BatchNorm1d affine params: PyTorch defaults gamma=1, beta=0
    gammas = jnp.ones((3, N), dtype=jnp.float32)
    betas = jnp.zeros((3, N), dtype=jnp.float32)

    out = hgcn_layer_pallas(feature, H, weights, gammas, betas)
    out = jax.block_until_ready(out)
    assert out.shape == (B, N, C)

    # Tight check against a reference with matched numerics (bf16 MXU operands).
    ref_bf16 = hgcn_layer_ref_matched(feature, H, weights, gammas, betas)
    assert jnp.allclose(out, ref_bf16, rtol=1e-3, atol=1e-3), \
        "mismatch vs matched-precision reference"

    # Looser check against the exact fp32 (PyTorch) semantics: differences are
    # only from the bf16 quantization of the MXU operands.
    ref_f32 = hgcn_layer_ref_f32(feature, H, weights, gammas, betas)
    assert jnp.allclose(out, ref_f32, rtol=5e-2, atol=5e-2), \
        "mismatch vs fp32 reference"

    print("KERNEL_OK")
</pallas_src>

<mosaic_0001>
module attributes {stable_mosaic.version = 11 : i64} {
  func.func @hgcn_kernel(%arg0: memref<2x8x16xf32, #tpu.memory_space<vmem>>, %arg1: memref<2x16x16xf32, #tpu.memory_space<vmem>>, %arg2: memref<3x8x8xbf16, #tpu.memory_space<vmem>>, %arg3: memref<3x2x16xf32, #tpu.memory_space<vmem>>, %arg4: memref<2x8x16xf32, #tpu.memory_space<vmem>>) attributes {dimension_semantics = [], scalar_prefetch = 0 : i64, scratch_operands = 0 : i64, tpu.core_type = #tpu.core_type<tc>} {
    %c0 = arith.constant 0 : index
    %c0_0 = arith.constant 0 : index
    %c0_1 = arith.constant 0 : index
    %0 = vector.load %arg0[%c0, %c0_0, %c0_1] : memref<2x8x16xf32, #tpu.memory_space<vmem>>, vector<2x8x16xf32>
    %c0_2 = arith.constant 0 : index
    %c0_3 = arith.constant 0 : index
    %c0_4 = arith.constant 0 : index
    %1 = vector.load %arg1[%c0_2, %c0_3, %c0_4] : memref<2x16x16xf32, #tpu.memory_space<vmem>>, vector<2x16x16xf32>
    %2 = arith.truncf %1 : vector<2x16x16xf32> to vector<2x16x16xbf16>
    %c0_5 = arith.constant 0 : index
    %c0_6 = arith.constant 0 : index
    %c0_7 = arith.constant 0 : index
    %3 = vector.load %arg2[%c0_5, %c0_6, %c0_7] : memref<3x8x8xbf16, #tpu.memory_space<vmem>>, vector<1x8x8xbf16>
    %4 = vector.shape_cast %3 : vector<1x8x8xbf16> to vector<8x8xbf16>
    %5 = vector.shape_cast %4 : vector<8x8xbf16> to vector<1x8x8xbf16>
    %6 = vector.broadcast %5 : vector<1x8x8xbf16> to vector<2x8x8xbf16>
    %7 = arith.truncf %0 : vector<2x8x16xf32> to vector<2x8x16xbf16>
    %cst = arith.constant dense<0.000000e+00> : vector<2x8x16xf32>
    %8 = tpu.matmul %6, %7, %cst {dimension_numbers = #tpu.dot_dimension_numbers<[2], [1], [1], [2], [0, 0, 0, 1, 1, 2], [0], [0]>} : vector<2x8x8xbf16>, vector<2x8x16xbf16>, vector<2x8x16xf32> -> vector<2x8x16xf32>
    %9 = arith.truncf %8 : vector<2x8x16xf32> to vector<2x8x16xbf16>
    %cst_8 = arith.constant dense<0.000000e+00> : vector<2x8x16xf32>
    %10 = tpu.matmul %9, %2, %cst_8 {dimension_numbers = #tpu.dot_dimension_numbers<[2], [2], [1], [1], [0, 0, 0, 1, 1, 1], [0], [0]>} : vector<2x8x16xbf16>, vector<2x16x16xbf16>, vector<2x8x16xf32> -> vector<2x8x16xf32>
    %cst_9 = arith.constant dense<0.000000e+00> : vector<16xf32>
    %11 = vector.multi_reduction <add>, %10, %cst_9 [0, 1] : vector<2x8x16xf32> to vector<16xf32>
    %12 = vector.shape_cast %11 : vector<16xf32> to vector<1x1x16xf32>
    %cst_10 = arith.constant 6.250000e-02 : f32
    %13 = vector.broadcast %cst_10 : f32 to vector<1x1x16xf32>
    %14 = arith.mulf %12, %13 : vector<1x1x16xf32>
    %15 = vector.broadcast %14 : vector<1x1x16xf32> to vector<2x8x16xf32>
    %16 = arith.subf %10, %15 : vector<2x8x16xf32>
    %17 = arith.mulf %16, %16 : vector<2x8x16xf32>
    %cst_11 = arith.constant dense<0.000000e+00> : vector<16xf32>
    %18 = vector.multi_reduction <add>, %17, %cst_11 [0, 1] : vector<2x8x16xf32> to vector<16xf32>
    %19 = vector.shape_cast %18 : vector<16xf32> to vector<1x1x16xf32>
    %cst_12 = arith.constant 6.250000e-02 : f32
    %20 = vector.broadcast %cst_12 : f32 to vector<1x1x16xf32>
    %21 = arith.mulf %19, %20 : vector<1x1x16xf32>
    %c0_13 = arith.constant 0 : index
    %c0_14 = arith.constant 0 : index
    %c0_15 = arith.constant 0 : index
    %22 = vector.load %arg3[%c0_13, %c0_14, %c0_15] : memref<3x2x16xf32, #tpu.memory_space<vmem>>, vector<1x2x16xf32>
    %23 = vector.shape_cast %22 : vector<1x2x16xf32> to vector<2x16xf32>
    %24 = vector.extract_strided_slice %23 {offsets = [0, 0], sizes = [1, 16], strides = [1, 1]} : vector<2x16xf32> to vector<1x16xf32>
    %25 = vector.shape_cast %24 : vector<1x16xf32> to vector<16xf32>
    %26 = vector.shape_cast %25 : vector<16xf32> to vector<1x1x16xf32>
    %27 = vector.extract_strided_slice %23 {offsets = [1, 0], sizes = [1, 16], strides = [1, 1]} : vector<2x16xf32> to vector<1x16xf32>
    %28 = vector.shape_cast %27 : vector<1x16xf32> to vector<16xf32>
    %29 = vector.shape_cast %28 : vector<16xf32> to vector<1x1x16xf32>
    %cst_16 = arith.constant 9.99999974E-6 : f32
    %30 = vector.broadcast %cst_16 : f32 to vector<1x1x16xf32>
    %31 = arith.addf %21, %30 : vector<1x1x16xf32>
    %32 = math.rsqrt %31 : vector<1x1x16xf32>
    %33 = arith.mulf %32, %26 : vector<1x1x16xf32>
    %34 = vector.broadcast %33 : vector<1x1x16xf32> to vector<2x8x16xf32>
    %35 = arith.mulf %16, %34 : vector<2x8x16xf32>
    %36 = vector.broadcast %29 : vector<1x1x16xf32> to vector<2x8x16xf32>
    %37 = arith.addf %35, %36 : vector<2x8x16xf32>
    %38 = arith.addf %0, %37 : vector<2x8x16xf32>
    %cst_17 = arith.constant 2.000000e+01 : f32
    %39 = vector.broadcast %cst_17 : f32 to vector<2x8x16xf32>
    %40 = arith.cmpf ogt, %38, %39 : vector<2x8x16xf32>
    %cst_18 = arith.constant 2.000000e+01 : f32
    %41 = vector.broadcast %cst_18 : f32 to vector<2x8x16xf32>
    %42 = arith.minimumf %38, %41 : vector<2x8x16xf32>
    %43 = math.exp %42 : vector<2x8x16xf32>
    %44 = math.log1p %43 : vector<2x8x16xf32>
    %45 = arith.select %40, %38, %44 : vector<2x8x16xi1>, vector<2x8x16xf32>
    %c1 = arith.constant 1 : index
    %c0_19 = arith.constant 0 : index
    %c0_20 = arith.constant 0 : index
    %46 = vector.load %arg2[%c1, %c0_19, %c0_20] : memref<3x8x8xbf16, #tpu.memory_space<vmem>>, vector<1x8x8xbf16>
    %47 = vector.shape_cast %46 : vector<1x8x8xbf16> to vector<8x8xbf16>
    %48 = vector.shape_cast %47 : vector<8x8xbf16> to vector<1x8x8xbf16>
    %49 = vector.broadcast %48 : vector<1x8x8xbf16> to vector<2x8x8xbf16>
    %50 = arith.truncf %45 : vector<2x8x16xf32> to vector<2x8x16xbf16>
    %cst_21 = arith.constant dense<0.000000e+00> : vector<2x8x16xf32>
    %51 = tpu.matmul %49, %50, %cst_21 {dimension_numbers = #tpu.dot_dimension_numbers<[2], [1], [1], [2], [0, 0, 0, 1, 1, 2], [0], [0]>} : vector<2x8x8xbf16>, vector<2x8x16xbf16>, vector<2x8x16xf32> -> vector<2x8x16xf32>
    %52 = arith.truncf %51 : vector<2x8x16xf32> to vector<2x8x16xbf16>
    %cst_22 = arith.constant dense<0.000000e+00> : vector<2x8x16xf32>
    %53 = tpu.matmul %52, %2, %cst_22 {dimension_numbers = #tpu.dot_dimension_numbers<[2], [2], [1], [1], [0, 0, 0, 1, 1, 1], [0], [0]>} : vector<2x8x16xbf16>, vector<2x16x16xbf16>, vector<2x8x16xf32> -> vector<2x8x16xf32>
    %cst_23 = arith.constant dense<0.000000e+00> : vector<16xf32>
    %54 = vector.multi_reduction <add>, %53, %cst_23 [0, 1] : vector<2x8x16xf32> to vector<16xf32>
    %55 = vector.shape_cast %54 : vector<16xf32> to vector<1x1x16xf32>
    %cst_24 = arith.constant 6.250000e-02 : f32
    %56 = vector.broadcast %cst_24 : f32 to vector<1x1x16xf32>
    %57 = arith.mulf %55, %56 : vector<1x1x16xf32>
    %58 = vector.broadcast %57 : vector<1x1x16xf32> to vector<2x8x16xf32>
    %59 = arith.subf %53, %58 : vector<2x8x16xf32>
    %60 = arith.mulf %59, %59 : vector<2x8x16xf32>
    %cst_25 = arith.constant dense<0.000000e+00> : vector<16xf32>
    %61 = vector.multi_reduction <add>, %60, %cst_25 [0, 1] : vector<2x8x16xf32> to vector<16xf32>
    %62 = vector.shape_cast %61 : vector<16xf32> to vector<1x1x16xf32>
    %cst_26 = arith.constant 6.250000e-02 : f32
    %63 = vector.broadcast %cst_26 : f32 to vector<1x1x16xf32>
    %64 = arith.mulf %62, %63 : vector<1x1x16xf32>
    %c1_27 = arith.constant 1 : index
    %c0_28 = arith.constant 0 : index
    %c0_29 = arith.constant 0 : index
    %65 = vector.load %arg3[%c1_27, %c0_28, %c0_29] : memref<3x2x16xf32, #tpu.memory_space<vmem>>, vector<1x2x16xf32>
    %66 = vector.shape_cast %65 : vector<1x2x16xf32> to vector<2x16xf32>
    %67 = vector.extract_strided_slice %66 {offsets = [0, 0], sizes = [1, 16], strides = [1, 1]} : vector<2x16xf32> to vector<1x16xf32>
    %68 = vector.shape_cast %67 : vector<1x16xf32> to vector<16xf32>
    %69 = vector.shape_cast %68 : vector<16xf32> to vector<1x1x16xf32>
    %70 = vector.extract_strided_slice %66 {offsets = [1, 0], sizes = [1, 16], strides = [1, 1]} : vector<2x16xf32> to vector<1x16xf32>
    %71 = vector.shape_cast %70 : vector<1x16xf32> to vector<16xf32>
    %72 = vector.shape_cast %71 : vector<16xf32> to vector<1x1x16xf32>
    %cst_30 = arith.constant 9.99999974E-6 : f32
    %73 = vector.broadcast %cst_30 : f32 to vector<1x1x16xf32>
    %74 = arith.addf %64, %73 : vector<1x1x16xf32>
    %75 = math.rsqrt %74 : vector<1x1x16xf32>
    %76 = arith.mulf %75, %69 : vector<1x1x16xf32>
    %77 = vector.broadcast %76 : vector<1x1x16xf32> to vector<2x8x16xf32>
    %78 = arith.mulf %59, %77 : vector<2x8x16xf32>
    %79 = vector.broadcast %72 : vector<1x1x16xf32> to vector<2x8x16xf32>
    %80 = arith.addf %78, %79 : vector<2x8x16xf32>
    %81 = arith.addf %0, %80 : vector<2x8x16xf32>
    %cst_31 = arith.constant 2.000000e+01 : f32
    %82 = vector.broadcast %cst_31 : f32 to vector<2x8x16xf32>
    %83 = arith.cmpf ogt, %81, %82 : vector<2x8x16xf32>
    %cst_32 = arith.constant 2.000000e+01 : f32
    %84 = vector.broadcast %cst_32 : f32 to vector<2x8x16xf32>
    %85 = arith.minimumf %81, %84 : vector<2x8x16xf32>
    %86 = math.exp %85 : vector<2x8x16xf32>
    %87 = math.log1p %86 : vector<2x8x16xf32>
    %88 = arith.select %83, %81, %87 : vector<2x8x16xi1>, vector<2x8x16xf32>
    %c2 = arith.constant 2 : index
    %c0_33 = arith.constant 0 : index
    %c0_34 = arith.constant 0 : index
    %89 = vector.load %arg2[%c2, %c0_33, %c0_34] : memref<3x8x8xbf16, #tpu.memory_space<vmem>>, vector<1x8x8xbf16>
    %90 = vector.shape_cast %89 : vector<1x8x8xbf16> to vector<8x8xbf16>
    %91 = vector.shape_cast %90 : vector<8x8xbf16> to vector<1x8x8xbf16>
    %92 = vector.broadcast %91 : vector<1x8x8xbf16> to vector<2x8x8xbf16>
    %93 = arith.truncf %88 : vector<2x8x16xf32> to vector<2x8x16xbf16>
    %cst_35 = arith.constant dense<0.000000e+00> : vector<2x8x16xf32>
    %94 = tpu.matmul %92, %93, %cst_35 {dimension_numbers = #tpu.dot_dimension_numbers<[2], [1], [1], [2], [0, 0, 0, 1, 1, 2], [0], [0]>} : vector<2x8x8xbf16>, vector<2x8x16xbf16>, vector<2x8x16xf32> -> vector<2x8x16xf32>
    %95 = arith.truncf %94 : vector<2x8x16xf32> to vector<2x8x16xbf16>
    %cst_36 = arith.constant dense<0.000000e+00> : vector<2x8x16xf32>
    %96 = tpu.matmul %95, %2, %cst_36 {dimension_numbers = #tpu.dot_dimension_numbers<[2], [2], [1], [1], [0, 0, 0, 1, 1, 1], [0], [0]>} : vector<2x8x16xbf16>, vector<2x16x16xbf16>, vector<2x8x16xf32> -> vector<2x8x16xf32>
    %cst_37 = arith.constant dense<0.000000e+00> : vector<16xf32>
    %97 = vector.multi_reduction <add>, %96, %cst_37 [0, 1] : vector<2x8x16xf32> to vector<16xf32>
    %98 = vector.shape_cast %97 : vector<16xf32> to vector<1x1x16xf32>
    %cst_38 = arith.constant 6.250000e-02 : f32
    %99 = vector.broadcast %cst_38 : f32 to vector<1x1x16xf32>
    %100 = arith.mulf %98, %99 : vector<1x1x16xf32>
    %101 = vector.broadcast %100 : vector<1x1x16xf32> to vector<2x8x16xf32>
    %102 = arith.subf %96, %101 : vector<2x8x16xf32>
    %103 = arith.mulf %102, %102 : vector<2x8x16xf32>
    %cst_39 = arith.constant dense<0.000000e+00> : vector<16xf32>
    %104 = vector.multi_reduction <add>, %103, %cst_39 [0, 1] : vector<2x8x16xf32> to vector<16xf32>
    %105 = vector.shape_cast %104 : vector<16xf32> to vector<1x1x16xf32>
    %cst_40 = arith.constant 6.250000e-02 : f32
    %106 = vector.broadcast %cst_40 : f32 to vector<1x1x16xf32>
    %107 = arith.mulf %105, %106 : vector<1x1x16xf32>
    %c2_41 = arith.constant 2 : index
    %c0_42 = arith.constant 0 : index
    %c0_43 = arith.constant 0 : index
    %108 = vector.load %arg3[%c2_41, %c0_42, %c0_43] : memref<3x2x16xf32, #tpu.memory_space<vmem>>, vector<1x2x16xf32>
    %109 = vector.shape_cast %108 : vector<1x2x16xf32> to vector<2x16xf32>
    %110 = vector.extract_strided_slice %109 {offsets = [0, 0], sizes = [1, 16], strides = [1, 1]} : vector<2x16xf32> to vector<1x16xf32>
    %111 = vector.shape_cast %110 : vector<1x16xf32> to vector<16xf32>
    %112 = vector.shape_cast %111 : vector<16xf32> to vector<1x1x16xf32>
    %113 = vector.extract_strided_slice %109 {offsets = [1, 0], sizes = [1, 16], strides = [1, 1]} : vector<2x16xf32> to vector<1x16xf32>
    %114 = vector.shape_cast %113 : vector<1x16xf32> to vector<16xf32>
    %115 = vector.shape_cast %114 : vector<16xf32> to vector<1x1x16xf32>
    %cst_44 = arith.constant 9.99999974E-6 : f32
    %116 = vector.broadcast %cst_44 : f32 to vector<1x1x16xf32>
    %117 = arith.addf %107, %116 : vector<1x1x16xf32>
    %118 = math.rsqrt %117 : vector<1x1x16xf32>
    %119 = arith.mulf %118, %112 : vector<1x1x16xf32>
    %120 = vector.broadcast %119 : vector<1x1x16xf32> to vector<2x8x16xf32>
    %121 = arith.mulf %102, %120 : vector<2x8x16xf32>
    %122 = vector.broadcast %115 : vector<1x1x16xf32> to vector<2x8x16xf32>
    %123 = arith.addf %121, %122 : vector<2x8x16xf32>
    %124 = arith.addf %0, %123 : vector<2x8x16xf32>
    %cst_45 = arith.constant 2.000000e+01 : f32
    %125 = vector.broadcast %cst_45 : f32 to vector<2x8x16xf32>
    %126 = arith.cmpf ogt, %124, %125 : vector<2x8x16xf32>
    %cst_46 = arith.constant 2.000000e+01 : f32
    %127 = vector.broadcast %cst_46 : f32 to vector<2x8x16xf32>
    %128 = arith.minimumf %124, %127 : vector<2x8x16xf32>
    %129 = math.exp %128 : vector<2x8x16xf32>
    %130 = math.log1p %129 : vector<2x8x16xf32>
    %131 = arith.select %126, %124, %130 : vector<2x8x16xi1>, vector<2x8x16xf32>
    %c0_47 = arith.constant 0 : index
    %c0_48 = arith.constant 0 : index
    %c0_49 = arith.constant 0 : index
    %132 = vector.load %arg4[%c0_47, %c0_48, %c0_49] : memref<2x8x16xf32, #tpu.memory_space<vmem>>, vector<2x8x16xf32>
    tpu.vector_store %arg4[%c0_47, %c0_48, %c0_49], %131 {strides = array<i32>} : memref<2x8x16xf32, #tpu.memory_space<vmem>>, vector<2x8x16xf32>,
    return
  }
}

</mosaic_0001>

<bundles_post_ra>
// kernel: hgcn_layer_pallas.1
= control target key start
LH: loop header
LB: loop body
LE: loop exit
PB: predicated region body
PF: predicated region fallthrough
CT: control target
= control target key end

     0   :  { %vm34_vm0 = vcmask 1043456   ;;  %v979_v2 = vmov 0.0   ;;  %vm980_vm1 = vmmov 0   ;;  %s1161_s0 = inlined_call_operand.vmem [shape: f32[2,8,16], index: 0, kind: input, shape index: {}]   ;;  %s1162_s1 = inlined_call_operand.vmem [shape: f32[2,16,16], index: 1, kind: input, shape index: {}]   ;;  %s1163_s2 = inlined_call_operand.vmem [shape: bf16[3,8,8], index: 2, kind: input, shape index: {}]   ;;  %s1164_s3 = inlined_call_operand.vmem [shape: f32[3,2,16], index: 3, kind: input, shape index: {}]   ;;  %s1165_s4 = inlined_call_operand.hbm [shape: f32[2,8,16], index: 4, kind: output, shape index: {}]  }
   0x1   :  { %v1012_v0 = vld [vmem:[%s1161_s0] sm:$0xff]  ;;  %v1017_v1 = vld [vmem:[%s1161_s0 + $0x8] sm:$0xff]  ;;  %848 = vmatprep.subr.bf16.mxu0 %v979_v2  ;;  %854 = vmatprep.subr.bf16.mxu1 %v979_v2 }
   0x2   :  { %v28_v3 = vpack.c.bf16 %v1012_v0, %v1012_v0  ;;  %v29_v4 = vpack.c.bf16 %v1017_v1, %v1017_v1  ;;  %850 = vmatprep.mubr.msk.bf16.mxu0 %vm980_vm1, %v979_v2  ;;  %856 = vmatprep.mubr.msk.bf16.mxu1 %vm980_vm1, %v979_v2  ;;  %v21_v5 = vld [vmem:[%s1162_s1] sm:$0xff] }
   0x3   :  { %9 = vsyncpa [#allocation3], 0  ;;  %v22_v8 = vld [vmem:[%s1162_s1 + $0x8] sm:$0xff]  ;;  %v23_v9 = vld [vmem:[%s1162_s1 + $0x10] sm:$0xff]  ;;  %vm30_vm2 = vcmask 64512   ;;  %vm123_vm3 = vcmask 130048   ;;  %v244_v59 = vlaneseq }
   0x4   :  { %v36_v6 = vsel %vm34_vm0, %v28_v3, 0  ;;  %v79_v7 = vsel %vm34_vm0, %v29_v4, 0  ;;  %v24_v10 = vld [vmem:[%s1162_s1 + $0x18] sm:$0xff]  ;;  %v27_v11 = vld [vmem:[%s1163_s2] sm:$0xf]  ;;  %v25_v12 = vpack.c.bf16 %v22_v8, %v21_v5 }
   0x5   :  { %849 = vmatpush3.bf16.msra.mxu0 %v36_v6  ;;  %855 = vmatpush3.bf16.msra.mxu1 %v79_v7  ;;  %v26_v13 = vpack.c.bf16 %v24_v10, %v23_v9  ;;  %v245_v60 = vshrl.u32 %v244_v59, 7  ;;  %v240_v61 = vld [vmem:[%s1164_s3] sm:$0x3] }
   0x6   :  { %860 = vmatprep.subr.bf16.mxu0 %v979_v2  ;;  %866 = vmatprep.subr.bf16.mxu1 %v979_v2  ;;  %v1055_v14 = vsel %vm123_vm3, %v25_v12, 0 }
   0x7   :  { %v1058_v15 = vsel %vm123_vm3, %v26_v13, 0  ;;  %v1077_v62 = vsub.s32 0, %v245_v60  ;;  %v1079_v63 = vsub.s32 1, %v245_v60 }
   0x8   :  { %851 = vmatmul.mubr.msk.bf16.vlgmr.msra.gmra.mrb[0].mxu0 %vm30_vm2, %v27_v11  ;;  %857 = vmatmul.mubr.msk.bf16.vlgmr.msra.gmra.mrb[0].mxu1 %vm30_vm2, %v27_v11 }
   0x9   :  { %862 = vmatprep.mubr.msk.bf16.mxu0 %vm980_vm1, %v979_v2  ;;  %868 = vmatprep.mubr.msk.bf16.mxu1 %vm980_vm1, %v979_v2  ;;  %v253_v6 = vrot.slane %v240_v61, %v1079_v63 }
   0xe   :  { %861 = vmatpush3.bf16.xpose.msra.mxu0 %v1055_v14  ;;  %867 = vmatpush3.bf16.xpose.msra.mxu1 %v1058_v15 }
   0xf   :  { %872 = vmatprep.subr.bf16.mxu0 %v979_v2  ;;  %878 = vmatprep.subr.bf16.mxu1 %v979_v2 }
  0xdb   :  { %v72_v16 = vpop.f32.mrb[0].mxu0  ;;  %v115_v17 = vpop.f32.mrb[0].mxu1 }
  0xdc   :  { %v121_v18 = vpack.c.bf16 %v72_v16, %v72_v16  ;;  %v122_v19 = vpack.c.bf16 %v115_v17, %v115_v17  ;;  %v852_v20 = vpop.f32.mrb[1].mxu0  ;;  %v858_v21 = vpop.f32.mrb[1].mxu1 }
  0xdd   :  { %v75_v22 = vpop.f32.mrb[2].mxu0  ;;  %v118_v23 = vpop.f32.mrb[2].mxu1 }
  0xde   :  { %v853_v24 = vpop.f32.mrb[3].mxu0  ;;  %v859_v25 = vpop.f32.mrb[3].mxu1  ;;  %863 = vmatmul.mubr.msk.bf16.vlgmr.msra.gmra.mrb[4].mxu0 %vm123_vm3, %v121_v18  ;;  %869 = vmatmul.mubr.msk.bf16.vlgmr.msra.gmra.mrb[4].mxu1 %vm123_vm3, %v122_v19 }
  0xdf   :  { %874 = vmatprep.mubr.msk.bf16.mxu0 %vm980_vm1, %v979_v2  ;;  %880 = vmatprep.mubr.msk.bf16.mxu1 %vm980_vm1, %v979_v2 }
 0x1b1   :  { %v164_v26 = vpop.f32.mrb[4].mxu0  ;;  %v210_v27 = vpop.f32.mrb[4].mxu1 }
 0x1b2   :  { %v216_v28 = vsel %vm123_vm3, %v164_v26, 0.0  ;;  %v217_v29 = vsel %vm123_vm3, %v210_v27, 0.0  ;;  %v864_v30 = vpop.f32.mrb[5].mxu0  ;;  %v870_v31 = vpop.f32.mrb[5].mxu1 }
 0x1b3   :  { %v218_v32 = vadd.f32 %v217_v29, %v216_v28  ;;  %v167_v33 = vpop.f32.mrb[6].mxu0  ;;  %v213_v34 = vpop.f32.mrb[6].mxu1 }
 0x1b4   :  { %v865_v35 = vpop.f32.mrb[7].mxu0  ;;  %v871_v36 = vpop.f32.mrb[7].mxu1 }
 0x1b5   :  { %v219_v37 = vrot.slane %v218_v32, 4 }
 0x1b7   :  { %v220_v38 = vadd.f32 %v219_v37, %v218_v32 }
 0x1b9   :  { %v221_v39 = vrot.slane %v220_v38, 2 }
 0x1bb   :  { %v222_v40 = vadd.f32 %v221_v39, %v220_v38 }
 0x1bd   :  { %v223_v41 = vrot.slane %v222_v40, 1 }
 0x1bf   :  { %v224_v42 = vadd.f32 %v223_v41, %v222_v40 }
 0x1c1   :  { %v225_v43 = vmul.f32 0.0625, %v224_v42 }
 0x1c3   :  { %v226_v44 = vsub.f32 %v164_v26, %v225_v43  ;;  %v227_v45 = vsub.f32 %v210_v27, %v225_v43  ;;  %v812_v43 = vld [vmem:[%s1163_s2 + $0x4] sm:$0xf] }
 0x1c5   :  { %v228_v46 = vmul.f32 %v226_v44, %v226_v44  ;;  %v229_v47 = vmul.f32 %v227_v45, %v227_v45 }
 0x1c7   :  { %v230_v48 = vsel %vm123_vm3, %v228_v46, 0.0  ;;  %v231_v49 = vsel %vm123_vm3, %v229_v47, 0.0 }
 0x1c8   :  { %v232_v50 = vadd.f32 %v231_v49, %v230_v48 }
 0x1ca   :  { %v233_v51 = vrot.slane %v232_v50, 4 }
 0x1cc   :  { %v234_v52 = vadd.f32 %v233_v51, %v232_v50 }
 0x1ce   :  { %v235_v53 = vrot.slane %v234_v52, 2 }
 0x1d0   :  { %v236_v54 = vadd.f32 %v235_v53, %v234_v52 }
 0x1d2   :  { %v237_v55 = vrot.slane %v236_v54, 1 }
 0x1d4   :  { %v238_v56 = vadd.f32 %v237_v55, %v236_v54 }
 0x1d6   :  { %v239_v57 = vmul.f32 0.0625, %v238_v56 }
 0x1d8   :  { %v241_v58 = vadd.f32 1e-05, %v239_v57 }
 0x1da   :  { %925 = vrsqrt.f32 %v241_v58 }
 0x1e4   :  { %v926_v3 = vpop.eup %925 }
 0x1e5   :  { %v243_v4 = vmul.f32 %v926_v3, %v240_v61 }
 0x1e7   :  { %v247_v5 = vrot.slane %v243_v4, %v1077_v62 }
 0x1e9   :  { %v248_v7 = vmul.f32 %v247_v5, %v226_v44  ;;  %v249_v8 = vmul.f32 %v247_v5, %v227_v45 }
 0x1eb   :  { %v254_v9 = vadd.f32 %v253_v6, %v248_v7  ;;  %v255_v10 = vadd.f32 %v253_v6, %v249_v8 }
 0x1ed   :  { %v257_v11 = vadd.f32 %v255_v10, %v1017_v1  ;;  %v256_v12 = vadd.f32 %v254_v9, %v1012_v0 }
 0x1ef   :  { %v261_v13 = vmin.f32 %v257_v11, 20.0  ;;  %v260_v16 = vmin.f32 %v256_v12, 20.0  ;;  %vm259_vm6 = vcmp.gt.f32.partialorder %v257_v11, 20.0  ;;  %vm258_vm7 = vcmp.gt.f32.partialorder %v256_v12, 20.0 }
 0x1f1   :  { %v264_v17 = vmul.f32 1.442695, %v261_v13  ;;  %v262_v18 = vmul.f32 1.442695, %v260_v16 }
 0x1f3   :  { %927 = vpow2.f32 %v264_v17 }
 0x1f4   :  { %929 = vpow2.f32 %v262_v18 }
 0x1fd   :  { %v928_v19 = vpop.eup %927 }
 0x1fe   :  { %v930_v20 = vpop.eup %929  ;;  %v275_v21 = vadd.f32 1.0, %v928_v19  ;;  %v278_v23 = vmul.f32 -0.5, %v928_v19  ;;  %v281_v27 = vand.u32 2147483647, %v928_v19 }
 0x1ff   :  { %v266_v22 = vadd.f32 1.0, %v930_v20  ;;  %v269_v24 = vmul.f32 -0.5, %v930_v20  ;;  %v272_v28 = vand.u32 2147483647, %v930_v20 }
 0x200   :  { %931 = vlog2.f32 %v275_v21  ;;  %v279_v25 = vadd.f32 1.0, %v278_v23  ;;  %vm282_vm4 = vcmp.lt.f32.partialorder %v281_v27, 0.0004427343 }
 0x201   :  { %933 = vlog2.f32 %v266_v22  ;;  %v270_v26 = vadd.f32 1.0, %v269_v24  ;;  %vm273_vm5 = vcmp.lt.f32.partialorder %v272_v28, 0.0004427343 }
 0x202   :  { %v280_v32 = vmul.f32 %v928_v19, %v279_v25 }
 0x203   :  { %v271_v34 = vmul.f32 %v930_v20, %v270_v26 }
 0x20a   :  { %v932_v29 = vpop.eup %931 }
 0x20b   :  { %v934_v30 = vpop.eup %933  ;;  %v277_v31 = vmul.f32 0.6931472, %v932_v29 }
 0x20c   :  { %v268_v33 = vmul.f32 0.6931472, %v934_v30  ;;  %v817_v30 = vld [vmem:[%s1164_s3 + $0x2] sm:$0x3] }
 0x20d   :  { %v283_v35 = vsel %vm282_vm4, %v280_v32, %v277_v31 }
 0x20e   :  { %v274_v36 = vsel %vm273_vm5, %v271_v34, %v268_v33  ;;  %v285_v37 = vsel %vm259_vm6, %v257_v11, %v283_v35  ;;  %v505_v34 = vrot.slane %v817_v30, %v1079_v63 }
 0x20f   :  { %v284_v38 = vsel %vm258_vm7, %v256_v12, %v274_v36  ;;  %v289_v39 = vpack.c.bf16 %v285_v37, %v285_v37 }
 0x210   :  { %v288_v40 = vpack.c.bf16 %v284_v38, %v284_v38 }
 0x211   :  { %v337_v41 = vsel %vm34_vm0, %v289_v39, 0 }
 0x212   :  { %v294_v42 = vsel %vm34_vm0, %v288_v40, 0  ;;  %879 = vmatpush3.bf16.msra.mxu1 %v337_v41 }
 0x213   :  { %873 = vmatpush3.bf16.msra.mxu0 %v294_v42  ;;  %890 = vmatprep.subr.bf16.mxu1 %v979_v2 }
 0x214   :  { %884 = vmatprep.subr.bf16.mxu0 %v979_v2 }
 0x215   :  { %881 = vmatmul.mubr.msk.bf16.vlgmr.msra.gmra.mrb[8].mxu1 %vm30_vm2, %v812_v43 }
 0x216   :  { %875 = vmatmul.mubr.msk.bf16.vlgmr.msra.gmra.mrb[8].mxu0 %vm30_vm2, %v812_v43  ;;  %892 = vmatprep.mubr.msk.bf16.mxu1 %vm980_vm1, %v979_v2 }
 0x217   :  { %886 = vmatprep.mubr.msk.bf16.mxu0 %vm980_vm1, %v979_v2 }
 0x21b   :  { %891 = vmatpush3.bf16.xpose.msra.mxu1 %v1058_v15 }
 0x21c   :  { %885 = vmatpush3.bf16.xpose.msra.mxu0 %v1055_v14  ;;  %902 = vmatprep.subr.bf16.mxu1 %v979_v2 }
 0x21d   :  { %896 = vmatprep.subr.bf16.mxu0 %v979_v2 }
 0x2e8   :  { %v373_v44 = vpop.f32.mrb[8].mxu1 }
 0x2e9   :  { %v330_v45 = vpop.f32.mrb[8].mxu0  ;;  %v380_v46 = vpack.c.bf16 %v373_v44, %v373_v44  ;;  %v882_v47 = vpop.f32.mrb[9].mxu1 }
 0x2ea   :  { %v379_v48 = vpack.c.bf16 %v330_v45, %v330_v45  ;;  %v876_v49 = vpop.f32.mrb[9].mxu0  ;;  %v376_v50 = vpop.f32.mrb[10].mxu1 }
 0x2eb   :  { %v333_v51 = vpop.f32.mrb[10].mxu0  ;;  %v883_v52 = vpop.f32.mrb[11].mxu1  ;;  %893 = vmatmul.mubr.msk.bf16.vlgmr.msra.gmra.mrb[12].mxu1 %vm123_vm3, %v380_v46 }
 0x2ec   :  { %v877_v53 = vpop.f32.mrb[11].mxu0  ;;  %887 = vmatmul.mubr.msk.bf16.vlgmr.msra.gmra.mrb[12].mxu0 %vm123_vm3, %v379_v48  ;;  %904 = vmatprep.mubr.msk.bf16.mxu1 %vm980_vm1, %v979_v2 }
 0x2ed   :  { %898 = vmatprep.mubr.msk.bf16.mxu0 %vm980_vm1, %v979_v2 }
 0x3be   :  { %v461_v54 = vpop.f32.mrb[12].mxu1 }
 0x3bf   :  { %v418_v55 = vpop.f32.mrb[12].mxu0  ;;  %v468_v56 = vsel %vm123_vm3, %v461_v54, 0.0  ;;  %v894_v57 = vpop.f32.mrb[13].mxu1 }
 0x3c0   :  { %v467_v58 = vsel %vm123_vm3, %v418_v55, 0.0  ;;  %v888_v59 = vpop.f32.mrb[13].mxu0  ;;  %v464_v60 = vpop.f32.mrb[14].mxu1 }
 0x3c1   :  { %v469_v61 = vadd.f32 %v468_v56, %v467_v58  ;;  %v421_v3 = vpop.f32.mrb[14].mxu0  ;;  %v895_v4 = vpop.f32.mrb[15].mxu1 }
 0x3c2   :  { %v889_v5 = vpop.f32.mrb[15].mxu0 }
 0x3c3   :  { %v470_v6 = vrot.slane %v469_v61, 4 }
 0x3c5   :  { %v471_v7 = vadd.f32 %v470_v6, %v469_v61 }
 0x3c7   :  { %v472_v8 = vrot.slane %v471_v7, 2 }
 0x3c9   :  { %v473_v9 = vadd.f32 %v472_v8, %v471_v7 }
 0x3cb   :  { %v474_v10 = vrot.slane %v473_v9, 1 }
 0x3cd   :  { %v475_v11 = vadd.f32 %v474_v10, %v473_v9  ;;  %v818_v10 = vld [vmem:[%s1163_s2 + $0x8] sm:$0xf] }
 0x3cf   :  { %v476_v12 = vmul.f32 0.0625, %v475_v11 }
 0x3d1   :  { %v477_v13 = vsub.f32 %v418_v55, %v476_v12  ;;  %v478_v16 = vsub.f32 %v461_v54, %v476_v12 }
 0x3d3   :  { %v479_v17 = vmul.f32 %v477_v13, %v477_v13  ;;  %v480_v18 = vmul.f32 %v478_v16, %v478_v16 }
 0x3d5   :  { %v481_v19 = vsel %vm123_vm3, %v479_v17, 0.0  ;;  %v482_v20 = vsel %vm123_vm3, %v480_v18, 0.0 }
 0x3d6   :  { %v483_v21 = vadd.f32 %v482_v20, %v481_v19 }
 0x3d8   :  { %v484_v22 = vrot.slane %v483_v21, 4 }
 0x3da   :  { %v485_v23 = vadd.f32 %v484_v22, %v483_v21 }
 0x3dc   :  { %v486_v24 = vrot.slane %v485_v23, 2 }
 0x3de   :  { %v487_v25 = vadd.f32 %v486_v24, %v485_v23 }
 0x3e0   :  { %v488_v26 = vrot.slane %v487_v25, 1 }
 0x3e2   :  { %v489_v27 = vadd.f32 %v488_v26, %v487_v25 }
 0x3e4   :  { %v490_v28 = vmul.f32 0.0625, %v489_v27 }
 0x3e6   :  { %v493_v29 = vadd.f32 1e-05, %v490_v28 }
 0x3e8   :  { %935 = vrsqrt.f32 %v493_v29 }
 0x3f2   :  { %v936_v31 = vpop.eup %935 }
 0x3f3   :  { %v495_v32 = vmul.f32 %v936_v31, %v817_v30 }
 0x3f5   :  { %v499_v33 = vrot.slane %v495_v32, %v1077_v62 }
 0x3f7   :  { %v500_v35 = vmul.f32 %v499_v33, %v477_v13  ;;  %v501_v36 = vmul.f32 %v499_v33, %v478_v16 }
 0x3f9   :  { %v506_v37 = vadd.f32 %v505_v34, %v500_v35  ;;  %v507_v38 = vadd.f32 %v505_v34, %v501_v36 }
 0x3fb   :  { %v509_v39 = vadd.f32 %v507_v38, %v1017_v1  ;;  %v508_v40 = vadd.f32 %v506_v37, %v1012_v0 }
 0x3fd   :  { %v513_v41 = vmin.f32 %v509_v39, 20.0  ;;  %v512_v42 = vmin.f32 %v508_v40, 20.0  ;;  %vm511_vm10 = vcmp.gt.f32.partialorder %v509_v39, 20.0  ;;  %vm510_vm11 = vcmp.gt.f32.partialorder %v508_v40, 20.0 }
 0x3ff   :  { %v516_v43 = vmul.f32 1.442695, %v513_v41  ;;  %v514_v44 = vmul.f32 1.442695, %v512_v42 }
 0x401   :  { %937 = vpow2.f32 %v516_v43 }
 0x402   :  { %939 = vpow2.f32 %v514_v44 }
 0x40b   :  { %v938_v45 = vpop.eup %937 }
 0x40c   :  { %v940_v46 = vpop.eup %939  ;;  %v527_v47 = vadd.f32 1.0, %v938_v45  ;;  %v530_v49 = vmul.f32 -0.5, %v938_v45  ;;  %v533_v53 = vand.u32 2147483647, %v938_v45 }
 0x40d   :  { %v518_v48 = vadd.f32 1.0, %v940_v46  ;;  %v521_v50 = vmul.f32 -0.5, %v940_v46  ;;  %v524_v54 = vand.u32 2147483647, %v940_v46 }
 0x40e   :  { %941 = vlog2.f32 %v527_v47  ;;  %v531_v51 = vadd.f32 1.0, %v530_v49  ;;  %vm534_vm8 = vcmp.lt.f32.partialorder %v533_v53, 0.0004427343  ;;  %v823_v53 = vld [vmem:[%s1164_s3 + $0x4] sm:$0x3]  ;;  %s981_s3 = smov [#allocation2]  }
 0x40f   :  { %943 = vlog2.f32 %v518_v48  ;;  %v522_v52 = vadd.f32 1.0, %v521_v50  ;;  %vm525_vm9 = vcmp.lt.f32.partialorder %v524_v54, 0.0004427343  ;;  %s797_s10 = sshll.u32 %s981_s3, 4  ;;  %s798_s10 = int_to_ptr.vmem [resolvable:$true] %s797_s10 }
 0x410   :  { %v532_v58 = vmul.f32 %v938_v45, %v531_v51  ;;  %s955_s11 = scalar_lea.vmem %s798_s10, 256  ;;  %p960_p1 = scmp.lt.s32.totalorder %s798_s10, %s798_s10 }
 0x411   :  { %v523_v60 = vmul.f32 %v940_v46, %v522_v52  ;;  %p956_p0 = scmp.ne.s32.totalorder %s798_s10, %s955_s11  ;;  %p961_p2 = scmp.lt.s32.totalorder %s955_s11, %s955_s11 }
 0x413   :  { %p962_p3 = por %p961_p2, %p960_p1 }
 0x415   :  { %p963_p4 = pnand %p962_p3, %p956_p0 }
 0x418   :  { %v942_v55 = vpop.eup %941 }
 0x419   :  { %v944_v56 = vpop.eup %943  ;;  %v529_v57 = vmul.f32 0.6931472, %v942_v55 }
 0x41a   :  { %v520_v59 = vmul.f32 0.6931472, %v944_v56 }
 0x41b   :  { %v535_v61 = vsel %vm534_vm8, %v532_v58, %v529_v57  ;;  %v757_v57 = vrot.slane %v823_v53, %v1079_v63 }
 0x41c   :  { %v526_v3 = vsel %vm525_vm9, %v523_v60, %v520_v59  ;;  %v537_v4 = vsel %vm511_vm10, %v509_v39, %v535_v61 }
 0x41d   :  { %v536_v5 = vsel %vm510_vm11, %v508_v40, %v526_v3  ;;  %v541_v6 = vpack.c.bf16 %v537_v4, %v537_v4 }
 0x41e   :  { %v540_v7 = vpack.c.bf16 %v536_v5, %v536_v5 }
 0x41f   :  { %v589_v8 = vsel %vm34_vm0, %v541_v6, 0 }
 0x420   :  { %v546_v9 = vsel %vm34_vm0, %v540_v7, 0  ;;  %903 = vmatpush3.bf16.msra.mxu1 %v589_v8 }
 0x421   :  { %897 = vmatpush3.bf16.msra.mxu0 %v546_v9  ;;  %914 = vmatprep.subr.bf16.mxu1 %v979_v2 }
 0x422   :  { %908 = vmatprep.subr.bf16.mxu0 %v979_v2 }
 0x423   :  { %905 = vmatmul.mubr.msk.bf16.vlgmr.msra.gmra.mrb[16].mxu1 %vm30_vm2, %v818_v10 }
 0x424   :  { %899 = vmatmul.mubr.msk.bf16.vlgmr.msra.gmra.mrb[16].mxu0 %vm30_vm2, %v818_v10  ;;  %916 = vmatprep.mubr.msk.bf16.mxu1 %vm980_vm1, %v979_v2 }
 0x425   :  { %910 = vmatprep.mubr.msk.bf16.mxu0 %vm980_vm1, %v979_v2 }
 0x429   :  { %915 = vmatpush3.bf16.xpose.msra.mxu1 %v1058_v15 }
 0x42a   :  { %909 = vmatpush3.bf16.xpose.msra.mxu0 %v1055_v14 }
 0x4f6   :  { %v625_v11 = vpop.f32.mrb[16].mxu1 }
 0x4f7   :  { %v582_v12 = vpop.f32.mrb[16].mxu0  ;;  %v632_v13 = vpack.c.bf16 %v625_v11, %v625_v11  ;;  %v906_v16 = vpop.f32.mrb[17].mxu1 }
 0x4f8   :  { %v631_v17 = vpack.c.bf16 %v582_v12, %v582_v12  ;;  %v900_v18 = vpop.f32.mrb[17].mxu0  ;;  %v628_v19 = vpop.f32.mrb[18].mxu1 }
 0x4f9   :  { %917 = vmatmul.mubr.msk.bf16.vlgmr.msra.gmra.mrb[20].mxu1 %vm123_vm3, %v632_v13  ;;  %v585_v20 = vpop.f32.mrb[18].mxu0  ;;  %v907_v21 = vpop.f32.mrb[19].mxu1 }
 0x4fa   :  { %911 = vmatmul.mubr.msk.bf16.vlgmr.msra.gmra.mrb[20].mxu0 %vm123_vm3, %v631_v17  ;;  %v901_v22 = vpop.f32.mrb[19].mxu0 }
 0x5cc   :  { %v713_v23 = vpop.f32.mrb[20].mxu1 }
 0x5cd   :  { %v670_v2 = vpop.f32.mrb[20].mxu0  ;;  %v720_v15 = vsel %vm123_vm3, %v713_v23, 0.0  ;;  %v918_v24 = vpop.f32.mrb[21].mxu1 }
 0x5ce   :  { %v719_v14 = vsel %vm123_vm3, %v670_v2, 0.0  ;;  %v912_v25 = vpop.f32.mrb[21].mxu0  ;;  %v716_v26 = vpop.f32.mrb[22].mxu1 }
 0x5cf   :  { %v721_v27 = vadd.f32 %v720_v15, %v719_v14  ;;  %v673_v28 = vpop.f32.mrb[22].mxu0  ;;  %v919_v29 = vpop.f32.mrb[23].mxu1 }
 0x5d0   :  { %v913_v30 = vpop.f32.mrb[23].mxu0 }
 0x5d1   :  { %v722_v31 = vrot.slane %v721_v27, 4 }
 0x5d3   :  { %v723_v32 = vadd.f32 %v722_v31, %v721_v27 }
 0x5d5   :  { %v724_v33 = vrot.slane %v723_v32, 2 }
 0x5d7   :  { %v725_v34 = vadd.f32 %v724_v33, %v723_v32 }
 0x5d9   :  { %v726_v35 = vrot.slane %v725_v34, 1 }
 0x5db   :  { %v727_v36 = vadd.f32 %v726_v35, %v725_v34 }
 0x5dd   :  { %v728_v37 = vmul.f32 0.0625, %v727_v36 }
 0x5df   :  { %v729_v38 = vsub.f32 %v670_v2, %v728_v37  ;;  %v730_v39 = vsub.f32 %v713_v23, %v728_v37 }
 0x5e1   :  { %v731_v40 = vmul.f32 %v729_v38, %v729_v38  ;;  %v732_v41 = vmul.f32 %v730_v39, %v730_v39 }
 0x5e3   :  { %v733_v42 = vsel %vm123_vm3, %v731_v40, 0.0  ;;  %v734_v43 = vsel %vm123_vm3, %v732_v41, 0.0 }
 0x5e4   :  { %v735_v44 = vadd.f32 %v734_v43, %v733_v42 }
 0x5e6   :  { %v736_v45 = vrot.slane %v735_v44, 4 }
 0x5e8   :  { %v737_v46 = vadd.f32 %v736_v45, %v735_v44 }
 0x5ea   :  { %v738_v47 = vrot.slane %v737_v46, 2 }
 0x5ec   :  { %v739_v48 = vadd.f32 %v738_v47, %v737_v46 }
 0x5ee   :  { %v740_v49 = vrot.slane %v739_v48, 1 }
 0x5f0   :  { %v741_v50 = vadd.f32 %v740_v49, %v739_v48 }
 0x5f2   :  { %v742_v51 = vmul.f32 0.0625, %v741_v50 }
 0x5f4   :  { %v745_v52 = vadd.f32 1e-05, %v742_v51 }
 0x5f6   :  { %945 = vrsqrt.f32 %v745_v52 }
 0x600   :  { %v946_v54 = vpop.eup %945 }
 0x601   :  { %v747_v55 = vmul.f32 %v946_v54, %v823_v53 }
 0x603   :  { %v751_v56 = vrot.slane %v747_v55, %v1077_v62 }
 0x605   :  { %v752_v58 = vmul.f32 %v751_v56, %v729_v38  ;;  %v753_v59 = vmul.f32 %v751_v56, %v730_v39 }
 0x607   :  { %v758_v60 = vadd.f32 %v757_v57, %v752_v58  ;;  %v759_v61 = vadd.f32 %v757_v57, %v753_v59 }
 0x609   :  { %v760_v3 = vadd.f32 %v758_v60, %v1012_v0  ;;  %v761_v4 = vadd.f32 %v759_v61, %v1017_v1 }
 0x60b   :  { %v764_v5 = vmin.f32 %v760_v3, 20.0  ;;  %v765_v6 = vmin.f32 %v761_v4, 20.0  ;;  %vm762_vm13 = vcmp.gt.f32.partialorder %v760_v3, 20.0  ;;  %vm763_vm15 = vcmp.gt.f32.partialorder %v761_v4, 20.0 }
 0x60d   :  { %v766_v7 = vmul.f32 1.442695, %v764_v5  ;;  %v768_v8 = vmul.f32 1.442695, %v765_v6 }
 0x60f   :  { %947 = vpow2.f32 %v766_v7 }
 0x610   :  { %949 = vpow2.f32 %v768_v8 }
 0x619   :  { %v948_v9 = vpop.eup %947 }
 0x61a   :  { %v950_v10 = vpop.eup %949  ;;  %v770_v11 = vadd.f32 1.0, %v948_v9  ;;  %v773_v63 = vmul.f32 -0.5, %v948_v9  ;;  %v776_v16 = vand.u32 2147483647, %v948_v9 }
 0x61b   :  { %v779_v62 = vadd.f32 1.0, %v950_v10  ;;  %v782_v12 = vmul.f32 -0.5, %v950_v10  ;;  %v785_v0 = vand.u32 2147483647, %v950_v10 }
 0x61c   :  { %951 = vlog2.f32 %v770_v11  ;;  %v774_v13 = vadd.f32 1.0, %v773_v63  ;;  %vm777_vm12 = vcmp.lt.f32.partialorder %v776_v16, 0.0004427343 }
 0x61d   :  { %953 = vlog2.f32 %v779_v62  ;;  %v783_v17 = vadd.f32 1.0, %v782_v12  ;;  %vm786_vm14 = vcmp.lt.f32.partialorder %v785_v0, 0.0004427343 }
 0x61e   :  { %v775_v20 = vmul.f32 %v948_v9, %v774_v13 }
 0x61f   :  { %v784_v22 = vmul.f32 %v950_v10, %v783_v17 }
 0x626   :  { %v952_v18 = vpop.eup %951 }
 0x627   :  { %v954_v1 = vpop.eup %953  ;;  %v772_v19 = vmul.f32 0.6931472, %v952_v18 }
 0x628   :  { %v781_v21 = vmul.f32 0.6931472, %v954_v1 }
 0x629   :  { %v778_v23 = vsel %vm777_vm12, %v775_v20, %v772_v19 }
 0x62a   :  { %v787_v2 = vsel %vm786_vm14, %v784_v22, %v781_v21  ;;  %v788_v15 = vsel %vm762_vm13, %v760_v3, %v778_v23 }
 0x62b   :  { %v789_v24 = vsel %vm763_vm15, %v761_v4, %v787_v2  ;;  %790 = vst.msk [vmem:[#allocation2] sm:$0xff] %vm123_vm3, %v788_v15 }
 0x62c   :  { %791 = vst.msk [vmem:[#allocation2 + $0x8] sm:$0xff] %vm123_vm3, %v789_v24 }
 0x62d   :  { %966 = shalt.err (!%p963_p4)
}
 0x62e   :  { %s967_s14 = scalar_lea.hbm %s1165_s4, 256 }
 0x62f   :  { %p968_p5 = scmp.ne.s32.totalorder %s1165_s4, %s967_s14  ;;  %p971_p6 = scmp.lt.u32.totalorder %s967_s14, %s1165_s4 }
 0x631   :  { %p973_p7 = pnand %p971_p6, %p968_p5 }
 0x633   :  { %976 = shalt.err (!%p973_p7)
}
 0x634   :  { %s982_s0 = smov 128   ;;  %s983_s19 = smov 8  }
 0x635   :  { %803 = dma.vmem_to_hbm [thread:$0]  %s798_s10, 256, %s1165_s4, [#allocation3], %s982_s0, %s982_s0, %s983_s19  }
 0x636   :  { %977 = dma.done.wait [#allocation3], 256  }
 0x637   :  { %978 = vsyncadd [#allocation3], 4294967040 }
 0x638   :  { %807 = vsyncpa [#allocation3], 1 }

</bundles_post_ra>
